<compile_context>
chip_gen: v7x
topology: tpu7x:2x2x1
jax: 0.10.0
libtpu: 0.0.40
codegen_flags: <defaults>
</compile_context>

<pallas_src>
import functools

import jax
import jax.numpy as jnp
from jax.experimental import pallas as pl
from jax.experimental.pallas import tpu as pltpu


# ----------------------------------------------------------------------------- kernels


def _pool_kernel(x_ref, sum_ref, max_ref, *, hw_total, t_hw, n_tiles, n_s, n_p):
    """Tiled global sum + max over the flattened spatial axis.

    x_ref:   (b_block, C, t_hw)   native dtype
    sum_ref: (b_block, C) f32     partial sum for this (batch block, partition)
    max_ref: (b_block, C) f32     partial max
    Grid: (n_b, n_p, n_s).  Partition p owns spatial tiles
    [p*(n_tiles-n_s), p*(n_tiles-n_s)+n_s); when the tile count is odd the two
    partitions overlap by one tile, which is gated off so each tile is accumulated
    exactly once.
    """
    p = pl.program_id(1)
    s = pl.program_id(2)

    @pl.when(s == 0)
    def _init():
        sum_ref[...] = jnp.zeros_like(sum_ref)
        max_ref[...] = jnp.full_like(max_ref, -jnp.inf)

    def _acc(x_sum, x_max):
        # Sum accumulates in f32; the max reduce stays in the native dtype (packed
        # bf16 vregs) and only the tiny (b_block, C) result is upcast.
        sum_ref[...] += jnp.sum(x_sum.astype(jnp.float32), axis=-1)
        max_ref[...] = jnp.maximum(
            max_ref[...], jnp.max(x_max, axis=-1).astype(jnp.float32))

    def _full_step():
        x = x_ref[...]
        _acc(x, x)

    def _masked_step():
        # Only the globally-last tile can be ragged: mask out-of-range lanes.
        x = x_ref[...]
        lane = jax.lax.broadcasted_iota(jnp.int32, x.shape, 2)
        valid = ((n_tiles - 1) * t_hw + lane) < hw_total
        _acc(jnp.where(valid, x, jnp.zeros_like(x)),
             jnp.where(valid, x, jnp.full_like(x, -jnp.inf)))

    ragged = (hw_total % t_hw) != 0        # static
    overlap = n_p * n_s - n_tiles          # static; 0 or 1 since n_p <= 2
    is_last = (p == n_p - 1) & (s == n_s - 1)

    if overlap == 0 and not ragged:
        # Fully regular hot path: no masking, no gating.
        _full_step()
    else:
        is_dup = ((p == n_p - 1) & (s < overlap)) if overlap else False
        if not ragged:
            @pl.when(jnp.logical_not(is_dup))
            def _():
                _full_step()
        else:
            skip = jnp.logical_or(is_dup, is_last) if overlap else is_last

            @pl.when(jnp.logical_not(skip))
            def _():
                _full_step()

            @pl.when(is_last)
            def _():
                _masked_step()


def _mlp_kernel(sum_ref, max_ref, w1t_ref, w2t_ref, o_ref, *, inv_hw):
    """Combine partition partials, then fc2(relu(fc1(.))) on stacked [avg; max],
    split/add and sigmoid.

    sum_ref/max_ref: (n_p, b_block, C) f32
    w1t_ref: (C, hid) f32 ; w2t_ref: (hid, C) f32
    o_ref:   (b_block, C) output dtype
    """
    avg = jnp.sum(sum_ref[...], axis=0) * inv_hw          # (b_block, C)
    mx = jnp.max(max_ref[...], axis=0)                     # (b_block, C)
    v = jnp.concatenate([avg, mx], axis=0)                 # (2*b_block, C)
    h = jnp.maximum(
        jnp.dot(v, w1t_ref[...], preferred_element_type=jnp.float32), 0.0)
    y = jnp.dot(h, w2t_ref[...], preferred_element_type=jnp.float32)
    bb = avg.shape[0]
    o_ref[...] = jax.nn.sigmoid(y[:bb] + y[bb:]).astype(o_ref.dtype)


# ----------------------------------------------------------------------------- wrapper


def _choose_tiles(B, C, HW, itemsize, x_vmem_budget):
    """Pick (b_block, t_hw): double-buffered x tile within budget, steps big enough
    (~4 MiB) to amortize the ~0.35us per-step overhead."""

    def legal_hw(t):
        # Largest legal lane tile <= t (multiple of 128, or the full extent).
        if t >= HW or HW <= 128:
            return HW
        return max(128, (t // 128) * 128)

    if B <= 8:
        b_block = B
    else:
        b_block = 8
        full_row = C * HW * itemsize
        target = 4 * 1024 * 1024
        if full_row * b_block < target:
            # Small spatial extent: grow the batch block (multiples of 8) toward a
            # ~4 MiB step, but keep >= 2 batch blocks so the parallel batch axis can
            # still spread across v7x's two TensorCores.
            want = (target // max(1, full_row)) // 8 * 8
            want = min(int(want), 64, (B // 8) * 8, max(8, (B // 2) // 8 * 8))
            b_block = max(b_block, want)
        # v5e guard: very wide C can exceed the scoped VMEM even at the minimum tile.
        min_lane = min(HW, 128)
        while b_block > 8 and 2 * b_block * C * min_lane * itemsize > x_vmem_budget:
            b_block -= 8

    t_hw = legal_hw(x_vmem_budget // (2 * b_block * C * itemsize))
    return b_block, t_hw


def channel_attention1(x, w1, w2, *, hw_tile=None,
                       x_vmem_budget_bytes=20 * 1024 * 1024):
    """x: (B, C, H, W) NCHW.  w1: (C//r, C, 1, 1).  w2: (C, C//r, 1, 1)."""
    B, C, H, W = x.shape
    hidden = w1.shape[0]
    assert w1.shape == (hidden, C, 1, 1)
    assert w2.shape == (C, hidden, 1, 1)

    HW = H * W
    itemsize = jnp.dtype(x.dtype).itemsize
    x_flat = x.reshape(B, C, HW)                                      # native dtype in HBM
    w1t = jnp.transpose(w1.reshape(hidden, C)).astype(jnp.float32)    # (C, hidden)
    w2t = jnp.transpose(w2.reshape(C, hidden)).astype(jnp.float32)    # (hidden, C)

    b_block, t_hw = _choose_tiles(B, C, HW, itemsize, x_vmem_budget_bytes)
    if hw_tile is not None:
        # Guard caller-supplied tiles against the (., 128) lane rule.
        t_hw = HW if (hw_tile >= HW or HW <= 128) else max(128, (hw_tile // 128) * 128)

    n_b = pl.cdiv(B, b_block)
    n_tiles = pl.cdiv(HW, t_hw)

    # Spatial partitions: when the batch axis gives megacore nothing to split
    # (n_b == 1), split the spatial reduction in two so v7x's two TensorCores each
    # own half of the DMA/accumulate work.  Harmless sequential loop on v5e/v6e.
    n_p = 2 if (n_b == 1 and n_tiles >= 2) else 1
    n_s = pl.cdiv(n_tiles, n_p)
    part_start = n_tiles - n_s            # start tile of partition 1 (overlap-safe)

    x_vmem = 2 * b_block * C * t_hw * itemsize
    vmem_limit = int(max(32 * 1024 * 1024, x_vmem + 8 * b_block * C * 4 + (4 << 20)))

    pool = functools.partial(_pool_kernel, hw_total=HW, t_hw=t_hw,
                             n_tiles=n_tiles, n_s=n_s, n_p=n_p)

    sum_p, max_p = pl.pallas_call(
        pool,
        out_shape=(jax.ShapeDtypeStruct((n_p, B, C), jnp.float32),
                   jax.ShapeDtypeStruct((n_p, B, C), jnp.float32)),
        grid_spec=pltpu.PrefetchScalarGridSpec(
            num_scalar_prefetch=0,
            grid=(n_b, n_p, n_s),
            in_specs=[
                pl.BlockSpec((b_block, C, t_hw),
                             lambda b, p, s: (b, 0, p * part_start + s)),
            ],
            out_specs=(
                pl.BlockSpec((None, b_block, C), lambda b, p, s: (p, b, 0)),
                pl.BlockSpec((None, b_block, C), lambda b, p, s: (p, b, 0)),
            ),
        ),
        compiler_params=pltpu.CompilerParams(
            dimension_semantics=("parallel", "parallel", "arbitrary"),
            vmem_limit_bytes=vmem_limit,
        ),
        cost_estimate=pl.CostEstimate(
            flops=3 * B * C * HW,
            transcendentals=0,
            bytes_accessed=int(x_flat.size) * itemsize + 2 * n_p * B * C * 4,
        ),
    )(x_flat)

    # Tiny epilogue: combine partitions, fc1 -> relu -> fc2 (avg & max stacked into a
    # single pair of MXU matmuls), add, sigmoid.
    b2 = B if B <= 8 else 8
    n_b2 = pl.cdiv(B, b2)
    mlp = functools.partial(_mlp_kernel, inv_hw=1.0 / HW)

    out = pl.pallas_call(
        mlp,
        out_shape=jax.ShapeDtypeStruct((B, C), x.dtype),
        grid_spec=pltpu.PrefetchScalarGridSpec(
            num_scalar_prefetch=0,
            grid=(n_b2,),
            in_specs=[
                pl.BlockSpec((n_p, b2, C), lambda b: (0, b, 0)),
                pl.BlockSpec((n_p, b2, C), lambda b: (0, b, 0)),
                pl.BlockSpec((C, hidden), lambda b: (0, 0)),   # resident weights
                pl.BlockSpec((hidden, C), lambda b: (0, 0)),
            ],
            out_specs=pl.BlockSpec((b2, C), lambda b: (b, 0)),
        ),
        compiler_params=pltpu.CompilerParams(
            dimension_semantics=("parallel",),
        ),
        cost_estimate=pl.CostEstimate(
            flops=8 * B * C * hidden,
            transcendentals=B * C,
            bytes_accessed=2 * n_p * B * C * 4 + 2 * C * hidden * 4 + B * C * itemsize,
        ),
    )(sum_p, max_p, w1t, w2t)

    return out.reshape(B, C, 1, 1)


# ----------------------------------------------------------------------------- reference & test


def _reference(x, w1, w2):
    B, C, H, W = x.shape
    hidden = w1.shape[0]
    xf = x.astype(jnp.float32).reshape(B, C, H * W)
    avg = jnp.mean(xf, axis=-1)
    mx = jnp.max(xf, axis=-1)
    w1m = w1.reshape(hidden, C).astype(jnp.float32)
    w2m = w2.reshape(C, hidden).astype(jnp.float32)

    def mlp(v):
        return jnp.maximum(v @ w1m.T, 0.0) @ w2m.T

    return jax.nn.sigmoid(mlp(avg) + mlp(mx)).reshape(B, C, 1, 1)


if __name__ == "__main__":
    key = jax.random.PRNGKey(0)
    B, C, ratio = 2, 32, 8
    hidden = C // ratio

    kx, k1, k2, kx2, kx3 = jax.random.split(key, 5)
    w1 = jax.random.normal(k1, (hidden, C, 1, 1), dtype=jnp.float32) * (1.0 / (C ** 0.5))
    w2 = jax.random.normal(k2, (C, hidden, 1, 1), dtype=jnp.float32) * (1.0 / (hidden ** 0.5))

    # Case 1: canonical small shape -> single spatial tile, no masking path.
    x = jax.random.normal(kx, (B, C, 16, 16), dtype=jnp.float32)
    out = jax.block_until_ready(channel_attention1(x, w1, w2))
    ref = jax.block_until_ready(_reference(x, w1, w2))
    assert out.shape == (B, C, 1, 1)
    assert jnp.allclose(out, ref, atol=1e-5, rtol=1e-5), "mismatch vs reference (case 1)"

    # Case 2: HW=225, tile=128 -> even 2-way spatial partition + ragged last tile.
    x2 = jax.random.normal(kx2, (B, C, 15, 15), dtype=jnp.float32)
    out2 = jax.block_until_ready(channel_attention1(x2, w1, w2, hw_tile=128))
    assert jnp.allclose(out2, _reference(x2, w1, w2), atol=1e-5, rtol=1e-5), \
        "mismatch vs reference (case 2)"

    # Case 3: HW=324, tile=128 -> odd tile count (overlap-gated partition) + ragged tail.
    x3 = jax.random.normal(kx3, (B, C, 18, 18), dtype=jnp.float32)
    out3 = jax.block_until_ready(channel_attention1(x3, w1, w2, hw_tile=128))
    assert jnp.allclose(out3, _reference(x3, w1, w2), atol=1e-5, rtol=1e-5), \
        "mismatch vs reference (case 3)"

    # Case 4: bf16 input exercises the native-dtype max path.
    x4 = x.astype(jnp.bfloat16)
    out4 = jax.block_until_ready(channel_attention1(x4, w1, w2))
    assert jnp.allclose(out4.astype(jnp.float32), _reference(x4, w1, w2),
                        atol=2e-2, rtol=2e-2), "mismatch vs reference (case 4)"

    print("KERNEL_OK")
</pallas_src>

<mosaic_0001>
module attributes {stable_mosaic.version = 11 : i64} {
  func.func @_pool_kernel(%arg0: i32, %arg1: i32, %arg2: i32, %arg3: memref<2x32x256xf32, #tpu.memory_space<vmem>>, %arg4: memref<1x2x32xf32, #tpu.memory_space<vmem>>, %arg5: memref<1x2x32xf32, #tpu.memory_space<vmem>>) attributes {dimension_semantics = [#tpu.dimension_semantics<parallel>, #tpu.dimension_semantics<parallel>, #tpu.dimension_semantics<arbitrary>], iteration_bounds = array<i64: 1, 1, 1>, scalar_prefetch = 0 : i64, scratch_operands = 0 : i64, tpu.core_type = #tpu.core_type<tc>, window_params = [{transform_indices = @transform_0, window_bounds = array<i64: 2, 32, 256>}, {transform_indices = @transform_1, window_bounds = array<i64: 1, 2, 32>}, {transform_indices = @transform_2, window_bounds = array<i64: 1, 2, 32>}]} {
    %c0_i32 = arith.constant 0 : i32
    %0 = arith.cmpi eq, %arg2, %c0_i32 : i32
    %1 = arith.extui %0 : i1 to i32
    %c0_i32_0 = arith.constant 0 : i32
    %2 = arith.cmpi ne, %1, %c0_i32_0 : i32
    scf.if %2 {
      %cst_16 = arith.constant 0.000000e+00 : f32
      %18 = vector.broadcast %cst_16 : f32 to vector<2x32xf32>
      %c0_17 = arith.constant 0 : index
      %c0_18 = arith.constant 0 : index
      %c0_19 = arith.constant 0 : index
      %19 = vector.load %arg4[%c0_17, %c0_18, %c0_19] : memref<1x2x32xf32, #tpu.memory_space<vmem>>, vector<1x2x32xf32>
      %20 = vector.shape_cast %19 : vector<1x2x32xf32> to vector<2x32xf32>
      %21 = vector.shape_cast %18 : vector<2x32xf32> to vector<1x2x32xf32>
      tpu.vector_store %arg4[%c0_17, %c0_18, %c0_19], %21 {strides = array<i32>} : memref<1x2x32xf32, #tpu.memory_space<vmem>>, vector<1x2x32xf32>,
      %cst_20 = arith.constant 0xFF800000 : f32
      %22 = vector.broadcast %cst_20 : f32 to vector<2x32xf32>
      %c0_21 = arith.constant 0 : index
      %c0_22 = arith.constant 0 : index
      %c0_23 = arith.constant 0 : index
      %23 = vector.load %arg5[%c0_21, %c0_22, %c0_23] : memref<1x2x32xf32, #tpu.memory_space<vmem>>, vector<1x2x32xf32>
      %24 = vector.shape_cast %23 : vector<1x2x32xf32> to vector<2x32xf32>
      %25 = vector.shape_cast %22 : vector<2x32xf32> to vector<1x2x32xf32>
      tpu.vector_store %arg5[%c0_21, %c0_22, %c0_23], %25 {strides = array<i32>} : memref<1x2x32xf32, #tpu.memory_space<vmem>>, vector<1x2x32xf32>,
    } else {
    }
    %c0 = arith.constant 0 : index
    %c0_1 = arith.constant 0 : index
    %c0_2 = arith.constant 0 : index
    %3 = vector.load %arg3[%c0, %c0_1, %c0_2] : memref<2x32x256xf32, #tpu.memory_space<vmem>>, vector<2x32x256xf32>
    %c0_3 = arith.constant 0 : index
    %c0_4 = arith.constant 0 : index
    %c0_5 = arith.constant 0 : index
    %4 = vector.load %arg4[%c0_3, %c0_4, %c0_5] : memref<1x2x32xf32, #tpu.memory_space<vmem>>, vector<1x2x32xf32>
    %5 = vector.shape_cast %4 : vector<1x2x32xf32> to vector<2x32xf32>
    %cst = arith.constant dense<0.000000e+00> : vector<2x32xf32>
    %6 = vector.multi_reduction <add>, %3, %cst [2] : vector<2x32x256xf32> to vector<2x32xf32>
    %7 = arith.addf %5, %6 : vector<2x32xf32>
    %c0_6 = arith.constant 0 : index
    %c0_7 = arith.constant 0 : index
    %c0_8 = arith.constant 0 : index
    %8 = vector.load %arg4[%c0_6, %c0_7, %c0_8] : memref<1x2x32xf32, #tpu.memory_space<vmem>>, vector<1x2x32xf32>
    %9 = vector.shape_cast %8 : vector<1x2x32xf32> to vector<2x32xf32>
    %10 = vector.shape_cast %7 : vector<2x32xf32> to vector<1x2x32xf32>
    tpu.vector_store %arg4[%c0_6, %c0_7, %c0_8], %10 {strides = array<i32>} : memref<1x2x32xf32, #tpu.memory_space<vmem>>, vector<1x2x32xf32>,
    %c0_9 = arith.constant 0 : index
    %c0_10 = arith.constant 0 : index
    %c0_11 = arith.constant 0 : index
    %11 = vector.load %arg5[%c0_9, %c0_10, %c0_11] : memref<1x2x32xf32, #tpu.memory_space<vmem>>, vector<1x2x32xf32>
    %12 = vector.shape_cast %11 : vector<1x2x32xf32> to vector<2x32xf32>
    %cst_12 = arith.constant dense<0xFF800000> : vector<2x32xf32>
    %13 = vector.multi_reduction <maximumf>, %3, %cst_12 [2] : vector<2x32x256xf32> to vector<2x32xf32>
    %14 = arith.maximumf %12, %13 : vector<2x32xf32>
    %c0_13 = arith.constant 0 : index
    %c0_14 = arith.constant 0 : index
    %c0_15 = arith.constant 0 : index
    %15 = vector.load %arg5[%c0_13, %c0_14, %c0_15] : memref<1x2x32xf32, #tpu.memory_space<vmem>>, vector<1x2x32xf32>
    %16 = vector.shape_cast %15 : vector<1x2x32xf32> to vector<2x32xf32>
    %17 = vector.shape_cast %14 : vector<2x32xf32> to vector<1x2x32xf32>
    tpu.vector_store %arg5[%c0_13, %c0_14, %c0_15], %17 {strides = array<i32>} : memref<1x2x32xf32, #tpu.memory_space<vmem>>, vector<1x2x32xf32>,
    return
  }
  func.func @transform_0(%arg0: i32, %arg1: i32, %arg2: i32) -> (i32, i32, i32) {
    %c0_i32 = arith.constant 0 : i32
    %0 = arith.muli %arg1, %c0_i32 : i32
    %1 = arith.addi %0, %arg2 : i32
    %c0_i32_0 = arith.constant 0 : i32
    %c0_i32_1 = arith.constant 0 : i32
    return %arg0, %c0_i32_0, %1 : i32, i32, i32
  }
  func.func @transform_1(%arg0: i32, %arg1: i32, %arg2: i32) -> (i32, i32, i32) {
    %c0_i32 = arith.constant 0 : i32
    %c0_i32_0 = arith.constant 0 : i32
    return %arg1, %arg0, %c0_i32 : i32, i32, i32
  }
  func.func @transform_2(%arg0: i32, %arg1: i32, %arg2: i32) -> (i32, i32, i32) {
    %c0_i32 = arith.constant 0 : i32
    %c0_i32_0 = arith.constant 0 : i32
    return %arg1, %arg0, %c0_i32 : i32, i32, i32
  }
}

</mosaic_0001>

<bundles_post_ra>
// kernel: tpu_custom_call.1
= control target key start
LH: loop header
LB: loop body
LE: loop exit
PB: predicated region body
PF: predicated region fallthrough
CT: control target
= control target key end

     0   :  { %8 = vsyncpa [#allocation3], 0  ;;  %s393_s0 = inlined_call_operand.hbm [shape: f32[2,32,256], index: 0, kind: input, shape index: {}]   ;;  %s394_s1 = inlined_call_operand.hbm [shape: f32[1,2,32], index: 1, kind: output, shape index: {0}]   ;;  %s395_s2 = inlined_call_operand.hbm [shape: f32[1,2,32], index: 2, kind: output, shape index: {1}]  }
   0x1   :  { %9 = vsyncpa [#allocation4], 0 }
   0x2   :  { %10 = vsyncpa [#allocation7], 0  ;;  %s317_s9 = smov [#allocation2]   ;;  %s245_s13 = scalar_lea.hbm %s393_s0, 2048 }
   0x3   :  { %s16_s10 = sshll.u32 %s317_s9, 4  ;;  %p246_p0 = scmp.ne.s32.totalorder %s393_s0, %s245_s13  ;;  %s17_s10 = int_to_ptr.vmem [resolvable:$true] %s16_s10 }
   0x4   :  { %p249_p1 = scmp.lt.u32.totalorder %s245_s13, %s393_s0 }
   0x6   :  { %p251_p2 = pnand %p249_p1, %p246_p0 }
   0x8   :  { %254 = shalt.err (!%p251_p2)
}
   0x9   :  { %s255_s18 = scalar_lea.vmem %s17_s10, 2048  ;;  %p260_p4 = scmp.lt.s32.totalorder %s17_s10, %s17_s10 }
   0xa   :  { %p256_p3 = scmp.ne.s32.totalorder %s17_s10, %s255_s18  ;;  %p261_p5 = scmp.lt.s32.totalorder %s255_s18, %s255_s18 }
   0xc   :  { %p262_p6 = por %p261_p5, %p260_p4 }
   0xe   :  { %p263_p7 = pnand %p262_p6, %p256_p3 }
  0x10   :  { %266 = shalt.err (!%p263_p7)
}
  0x11   :  { %s318_s19 = smov 256   ;;  %s319_s20 = smov 16  }
  0x12   :  { %22 = dma.hbm_to_vmem [thread:$0]  %s393_s0, 2048, %s17_s10, [#allocation3], %s318_s19, %s318_s19, %s319_s20  }
  0x13   :  { %311 = dma.done.wait [#allocation3], 2048  }
  0x14   :  { %312 = vsyncadd [#allocation3], 4294965248  ;;  %v41_v0 = vld [vmem:[#allocation2 + $0x40] sm:$0xff]  ;;  %v42_v1 = vld [vmem:[#allocation2 + $0x48] sm:$0xff]  ;;  %vm30_vm0 = vcmask 254976   ;;  %v320_v32 = vmov 0.0   ;;  %v82_v38 = vlaneseq }
  0x15   :  { %v33_v2 = vld [vmem:[#allocation2] sm:$0xff]  ;;  %v62_v3 = vadd.f32 %v42_v1, %v41_v0  ;;  %v34_v4 = vld [vmem:[#allocation2 + $0x8] sm:$0xff]  ;;  %v43_v5 = vld [vmem:[#allocation2 + $0x50] sm:$0xff]  ;;  %v147_v15 = vmax.f32 %v41_v0, %v42_v1  ;;  %31 = vst.msk [vmem:[#allocation5] sm:$0x3] %vm30_vm0, %v320_v32  ;;  %v321_v33 = vmov -inf  }
  0x16   :  { %v44_v6 = vld [vmem:[#allocation2 + $0x58] sm:$0xff]  ;;  %v50_v7 = vadd.f32 %v34_v4, %v33_v2  ;;  %v35_v8 = vld [vmem:[#allocation2 + $0x10] sm:$0xff]  ;;  %v135_v13 = vmax.f32 %v33_v2, %v34_v4  ;;  %v45_v16 = vld [vmem:[#allocation2 + $0x60] sm:$0xff]  ;;  %32 = vst.msk [vmem:[#allocation6] sm:$0x3] %vm30_vm0, %v321_v33  ;;  %v83_v41 = vand.u32 127, %v82_v38 }
  0x17   :  { %v36_v9 = vld [vmem:[#allocation2 + $0x18] sm:$0xff]  ;;  %63 = vadd.xlane.f32.xlu1 %v62_v3  ;;  %v65_v10 = vadd.f32 %v44_v6, %v43_v5  ;;  %v150_v14 = vmax.f32 %v43_v5, %v44_v6  ;;  %v46_v17 = vld [vmem:[#allocation2 + $0x68] sm:$0xff]  ;;  %v37_v18 = vld [vmem:[#allocation2 + $0x20] sm:$0xff]  ;;  %v85_v45 = vshrl.u32 %v82_v38, 7  ;;  %vm93_vm1 = vcmask 130112   ;;  %s322_s0 = smov [#allocation5]  }
  0x18   :  { %51 = vadd.xlane.f32.xlu0 %v50_v7  ;;  %v53_v11 = vadd.f32 %v36_v9, %v35_v8  ;;  %v138_v12 = vmax.f32 %v35_v8, %v36_v9  ;;  %v38_v19 = vld [vmem:[#allocation2 + $0x28] sm:$0xff]  ;;  %v68_v20 = vadd.f32 %v46_v17, %v45_v16  ;;  %v153_v22 = vmax.f32 %v45_v16, %v46_v17  ;;  %v47_v24 = vld [vmem:[#allocation2 + $0x70] sm:$0xff]  ;;  %v48_v25 = vld [vmem:[#allocation2 + $0x78] sm:$0xff]  ;;  %s215_s23 = sshll.u32 %s322_s0, 4  ;;  %s323_s24 = smov [#allocation6]   ;;  %s216_s23 = int_to_ptr.vmem [resolvable:$true] %s215_s23 }
  0x19   :  { %v56_v21 = vadd.f32 %v38_v19, %v37_v18  ;;  %v141_v23 = vmax.f32 %v37_v18, %v38_v19  ;;  %v39_v26 = vld [vmem:[#allocation2 + $0x30] sm:$0xff]  ;;  %v40_v27 = vld [vmem:[#allocation2 + $0x38] sm:$0xff]  ;;  %v71_v28 = vadd.f32 %v48_v25, %v47_v24  ;;  %v156_v30 = vmax.f32 %v47_v24, %v48_v25  ;;  %s225_s25 = sshll.u32 %s323_s24, 4  ;;  %s267_s26 = scalar_lea.vmem %s216_s23, 32  ;;  %s226_s25 = int_to_ptr.vmem [resolvable:$true] %s225_s25 }
  0x1a   :  { %v59_v29 = vadd.f32 %v40_v27, %v39_v26  ;;  %v144_v31 = vmax.f32 %v39_v26, %v40_v27  ;;  %v88_v42 = vadd.s32 4294967288, %v83_v41  ;;  %v95_v46 = vadd.s32 4294967280, %v83_v41  ;;  %p268_p8 = scmp.ne.s32.totalorder %s216_s23, %s267_s26  ;;  %p272_p9 = scmp.lt.s32.totalorder %s216_s23, %s216_s23 }
  0x1b   :  { %66 = vadd.xlane.f32.xlu1 %v65_v10  ;;  %v102_v50 = vadd.s32 4294967272, %v83_v41  ;;  %v86_v51 = vsub.s32 %v83_v41, %v85_v45  ;;  %vm100_vm2 = vcmask 195712   ;;  %vm107_vm3 = vcmask 261312   ;;  %p273_p10 = scmp.lt.s32.totalorder %s267_s26, %s267_s26 }
  0x1c   :  { %54 = vadd.xlane.f32.xlu0 %v53_v11  ;;  %v91_v47 = vsub.s32 %v88_v42, %v85_v45  ;;  %v98_v52 = vsub.s32 %v95_v46, %v85_v45  ;;  %vm128_vm4 = vcmask 1041409  }
  0x1d   :  { %v105_v57 = vsub.s32 %v102_v50, %v85_v45  ;;  %v134_v26 = vld [vmem:[#allocation6] sm:$0x3]  ;;  %p274_p11 = por %p273_p10, %p272_p9 }
  0x1f   :  { %139 = vmax.xlane.f32.xlu1 %v138_v12  ;;  %p275_p12 = pnand %p274_p11, %p268_p8 }
  0x20   :  { %136 = vmax.xlane.f32.xlu0 %v135_v13  ;;  %v49_v13 = vld [vmem:[#allocation5] sm:$0x3] }
  0x23   :  { %151 = vmax.xlane.f32.xlu1 %v150_v14 }
  0x24   :  { %148 = vmax.xlane.f32.xlu0 %v147_v15 }
  0x27   :  { %69 = vadd.xlane.f32.xlu1 %v68_v20 }
  0x28   :  { %57 = vadd.xlane.f32.xlu0 %v56_v21 }
  0x2b   :  { %154 = vmax.xlane.f32.xlu1 %v153_v22 }
  0x2c   :  { %142 = vmax.xlane.f32.xlu0 %v141_v23 }
  0x2f   :  { %72 = vadd.xlane.f32.xlu1 %v71_v28 }
  0x30   :  { %60 = vadd.xlane.f32.xlu0 %v59_v29 }
  0x33   :  { %157 = vmax.xlane.f32.xlu1 %v156_v30 }
  0x34   :  { %145 = vmax.xlane.f32.xlu0 %v144_v31 }
  0xa4   :  { %v64_v34 = vpop.xlane.xlu1 %63 }
  0xa5   :  { %v52_v35 = vpop.xlane.xlu0 %51  ;;  %v112_v58 = vrot.slane %v64_v34, %v86_v51 }
  0xa6   :  { %v87_v59 = vrot.slane %v52_v35, %v86_v51 }
  0xa8   :  { %v67_v36 = vpop.xlane.xlu1 %66 }
  0xa9   :  { %v55_v37 = vpop.xlane.xlu0 %54  ;;  %v116_v53 = vrot.slane %v67_v36, %v91_v47 }
  0xaa   :  { %v92_v54 = vrot.slane %v55_v37, %v91_v47 }
  0xab   :  { %v117_v62 = vsel %vm93_vm1, %v116_v53, %v112_v58 }
  0xac   :  { %v140_v39 = vpop.xlane.xlu1 %139  ;;  %v94_v63 = vsel %vm93_vm1, %v92_v54, %v87_v59 }
  0xad   :  { %v137_v40 = vpop.xlane.xlu0 %136  ;;  %v174_v1 = vrot.slane %v140_v39, %v91_v47 }
  0xae   :  { %v170_v6 = vrot.slane %v137_v40, %v86_v51 }
  0xb0   :  { %v152_v43 = vpop.xlane.xlu1 %151  ;;  %v175_v20 = vsel %vm93_vm1, %v174_v1, %v170_v6 }
  0xb1   :  { %v149_v44 = vpop.xlane.xlu0 %148  ;;  %v193_v2 = vrot.slane %v152_v43, %v91_v47 }
  0xb2   :  { %v189_v3 = vrot.slane %v149_v44, %v86_v51 }
  0xb4   :  { %v70_v48 = vpop.xlane.xlu1 %69  ;;  %v194_v16 = vsel %vm93_vm1, %v193_v2, %v189_v3 }
  0xb5   :  { %v58_v49 = vpop.xlane.xlu0 %57  ;;  %v121_v60 = vrot.slane %v70_v48, %v98_v52 }
  0xb6   :  { %v99_v61 = vrot.slane %v58_v49, %v98_v52 }
  0xb7   :  { %v122_v7 = vsel %vm100_vm2, %v121_v60, %v117_v62 }
  0xb8   :  { %v155_v55 = vpop.xlane.xlu1 %154  ;;  %v101_v10 = vsel %vm100_vm2, %v99_v61, %v94_v63 }
  0xb9   :  { %v143_v56 = vpop.xlane.xlu0 %142  ;;  %v198_v8 = vrot.slane %v155_v55, %v98_v52 }
  0xba   :  { %v179_v11 = vrot.slane %v143_v56, %v98_v52 }
  0xbb   :  { %v199_v21 = vsel %vm100_vm2, %v198_v8, %v194_v16 }
  0xbc   :  { %v73_v0 = vpop.xlane.xlu1 %72  ;;  %v180_v24 = vsel %vm100_vm2, %v179_v11, %v175_v20 }
  0xbd   :  { %v126_v4 = vrot.slane %v73_v0, %v105_v57  ;;  %v61_v5 = vpop.xlane.xlu0 %60 }
  0xbe   :  { %v106_v9 = vrot.slane %v61_v5, %v105_v57 }
  0xbf   :  { %v127_v12 = vsel %vm107_vm3, %v126_v4, %v122_v7 }
  0xc0   :  { %v108_v14 = vsel %vm107_vm3, %v106_v9, %v101_v10  ;;  %v158_v15 = vpop.xlane.xlu1 %157 }
  0xc1   :  { %v129_v17 = vsel %vm128_vm4, %v127_v12, %v108_v14  ;;  %v203_v18 = vrot.slane %v158_v15, %v105_v57  ;;  %v146_v19 = vpop.xlane.xlu0 %145 }
  0xc2   :  { %v184_v22 = vrot.slane %v146_v19, %v105_v57  ;;  %v131_v23 = vadd.f32 %v129_v17, %v49_v13 }
  0xc3   :  { %v204_v25 = vsel %vm107_vm3, %v203_v18, %v199_v21 }
  0xc4   :  { %v185_v27 = vsel %vm107_vm3, %v184_v22, %v180_v24  ;;  %133 = vst.msk [vmem:[#allocation5] sm:$0x3] %vm30_vm0, %v131_v23 }
  0xc5   :  { %v205_v28 = vsel %vm128_vm4, %v204_v25, %v185_v27 }
  0xc6   :  { %278 = shalt.err (!%p275_p12)
}
  0xc7   :  { %s279_s29 = scalar_lea.hbm %s394_s1, 32 }
  0xc8   :  { %p280_p13 = scmp.ne.s32.totalorder %s394_s1, %s279_s29  ;;  %p283_p0 = scmp.lt.u32.totalorder %s279_s29, %s394_s1 }
  0xca   :  { %p285_p1 = pnand %p283_p0, %p280_p13 }
  0xcc   :  { %288 = shalt.err (!%p285_p1)
}
  0xcd   :  { %218 = dma.vmem_to_hbm [thread:$0]  %s216_s23, 32, %s394_s1, [#allocation4]   ;;  %v207_v29 = vmax.f32 %v134_v26, %v205_v28 }
  0xce   :  { %s289_s8 = scalar_lea.vmem %s226_s25, 32  ;;  %p294_p3 = scmp.lt.s32.totalorder %s226_s25, %s226_s25 }
  0xcf   :  { %208 = vst.msk [vmem:[#allocation6] sm:$0x3] %vm30_vm0, %v207_v29  ;;  %p290_p2 = scmp.ne.s32.totalorder %s226_s25, %s289_s8  ;;  %p295_p4 = scmp.lt.s32.totalorder %s289_s8, %s289_s8 }
  0xd1   :  { %p296_p5 = por %p295_p4, %p294_p3 }
  0xd3   :  { %p297_p6 = pnand %p296_p5, %p290_p2 }
  0xd5   :  { %300 = shalt.err (!%p297_p6)
}
  0xd6   :  { %s301_s11 = scalar_lea.hbm %s395_s2, 32 }
  0xd7   :  { %p302_p7 = scmp.ne.s32.totalorder %s395_s2, %s301_s11  ;;  %p305_p8 = scmp.lt.u32.totalorder %s301_s11, %s395_s2 }
  0xd9   :  { %p307_p9 = pnand %p305_p8, %p302_p7 }
  0xdb   :  { %310 = shalt.err (!%p307_p9)
}
  0xdc   :  { %228 = dma.vmem_to_hbm [thread:$0]  %s226_s25, 32, %s395_s2, [#allocation7]  }
  0xdd   :  { %313 = dma.done.wait [#allocation4], 32  }
  0xde   :  { %314 = vsyncadd [#allocation4], 4294967264 }
  0xdf   :  { %315 = dma.done.wait [#allocation7], 32  }
  0xe0   :  { %316 = vsyncadd [#allocation7], 4294967264 }
  0xe1   :  { %235 = vsyncpa [#allocation3], 1 }
  0xe2   :  { %236 = vsyncpa [#allocation4], 1 }
  0xe3   :  { %237 = vsyncpa [#allocation7], 1 }

</bundles_post_ra>
